<compile_context>
chip_gen: v6e
topology: v6e:2x2x1
jax: 0.10.0
libtpu: 0.0.40
codegen_flags: <defaults>
</compile_context>

<pallas_src>
import functools

import jax
import jax.numpy as jnp
from jax import lax
from jax.experimental import pallas as pl
from jax.experimental.pallas import tpu as pltpu


def _round_up(x, m):
    return (x + m - 1) // m * m


# ----------------------------------------------------------------------------
# Core Pallas kernel: channel-major conv-as-row-shifted-taps
#                     (+ bias + ReLU [+ fused 1x1 projection]).
# ----------------------------------------------------------------------------
def _conv_layer_pallas(z, w_cat_t, bias, offsets, out_rows_needed, *, proj=None,
                       out_dtype=jnp.float32, lane_chunk_cap=1024):
    """One conv layer over all images.

    z:           (BT, K, nat_rows) bf16 channel-major flattened padded
                 (space-to-depth) activation; row axis is the lane axis.
    w_cat_t:     (Cout, T*K) bf16 concatenated-tap weights (transposed).
    bias:        (Cout, 1) f32.
    offsets:     T static row offsets; tap t reads lanes [r + off_t].
    proj:        optional fused 1x1: (w_proj_t (D, Cout) bf16, b_proj (D,1) f32).
    Returns (BT, n_out, out_rows) in out_dtype; caller slices the valid rows.
    """
    z = z.astype(jnp.bfloat16)
    w_cat_t = w_cat_t.astype(jnp.bfloat16)
    bias = bias.astype(jnp.float32)

    BT, K, nat_rows = z.shape
    Cout, TK = w_cat_t.shape
    n_taps = len(offsets)
    assert TK == n_taps * K, (TK, n_taps, K)
    max_off = max(offsets)

    # Lane-chunked row tiling (static): bounded vreg pressure, dense stores.
    lane_chunk = min(_round_up(out_rows_needed, 128), lane_chunk_cap)
    out_rows = _round_up(out_rows_needed, lane_chunk)
    n_chunks = out_rows // lane_chunk
    rows_slab = _round_up(max(out_rows + max_off, nat_rows), 128)
    z = jnp.pad(z, ((0, 0), (0, 0), (0, rows_slab - nat_rows)))

    has_proj = proj is not None
    if has_proj:
        w_p, b_p = proj
        w_p = w_p.astype(jnp.bfloat16)      # (D, Cout)
        b_p = b_p.astype(jnp.float32)       # (D, 1)
        n_out = w_p.shape[0]
    else:
        n_out = Cout

    def kernel(z_ref, w_ref, b_ref, *rest):
        if has_proj:
            wp_ref, bp_ref, o_ref = rest
        else:
            (o_ref,) = rest
        wt = w_ref[...]                     # (Cout, T*K) bf16, VMEM resident
        bvec = b_ref[...]                   # (Cout, 1) f32
        if has_proj:
            wp = wp_ref[...]
            bp = bp_ref[...]
        for c in range(n_chunks):           # static unroll, static slice starts
            s = c * lane_chunk
            # Gather the T row-shifted tap views and stack them along the
            # contraction (sublane) axis -> one MXU matmul with K_total = T*K.
            x = jnp.concatenate(
                [z_ref[:, s + off: s + off + lane_chunk] for off in offsets],
                axis=0)                      # (T*K, lane_chunk) bf16
            acc = jnp.dot(wt, x, preferred_element_type=jnp.float32)
            y = jnp.maximum(acc + bvec, 0.0)          # bias + ReLU, f32
            if has_proj:                              # fused 1x1 projection
                y = jnp.dot(wp, y.astype(jnp.bfloat16),
                            preferred_element_type=jnp.float32) + bp
            o_ref[:, s: s + lane_chunk] = y.astype(o_ref.dtype)

    in_specs = [
        pl.BlockSpec((None, K, rows_slab), lambda i: (i, 0, 0)),   # per-image slab
        pl.BlockSpec((Cout, TK), lambda i: (0, 0)),                # resident weights
        pl.BlockSpec((Cout, 1), lambda i: (0, 0)),                 # resident bias
    ]
    inputs = [z, w_cat_t, bias]
    if has_proj:
        in_specs += [pl.BlockSpec((n_out, Cout), lambda i: (0, 0)),
                     pl.BlockSpec((n_out, 1), lambda i: (0, 0))]
        inputs += [w_p, b_p]

    # VMEM budget: double-buffered per-image slab + output block + weights,
    # plus in-kernel chunk intermediates and margin.  Capped at 48 MiB (v7x).
    z_blk = K * rows_slab * 2
    out_blk = n_out * out_rows * jnp.dtype(out_dtype).itemsize
    w_bytes = Cout * TK * 2 + Cout * 4 + (n_out * Cout * 2 + n_out * 4 if has_proj else 0)
    vmem_need = 2 * (z_blk + out_blk + w_bytes) + TK * lane_chunk * 2 + (4 << 20)
    vmem_limit = int(min(max(vmem_need, 32 << 20), 48 << 20))

    flops = 2 * BT * out_rows * TK * Cout
    if has_proj:
        flops += 2 * BT * out_rows * Cout * n_out
    bytes_accessed = (z.size * 2 + BT * out_blk + w_bytes)

    return pl.pallas_call(
        kernel,
        out_shape=jax.ShapeDtypeStruct((BT, n_out, out_rows), out_dtype),
        grid=(BT,),
        in_specs=in_specs,
        out_specs=pl.BlockSpec((None, n_out, out_rows), lambda i: (i, 0, 0)),
        compiler_params=pltpu.CompilerParams(
            dimension_semantics=("parallel",),
            vmem_limit_bytes=vmem_limit),
        cost_estimate=pl.CostEstimate(flops=flops, transcendentals=0,
                                      bytes_accessed=bytes_accessed),
    )(*inputs)


# ----------------------------------------------------------------------------
# Wrapper-side channel-major layout prep (padding / space-to-depth) + weights.
# ----------------------------------------------------------------------------
def _prep_stride2_cm(x_nchw):
    """3x3/stride-2/pad-1 input -> (BT, 4C, Hp*Wp) slab, tap offsets, Ho, Wrow."""
    BT, C, H, W = x_nchw.shape
    ph, pw = H % 2, W % 2
    if ph or pw:                       # odd spatial dims: zero-pad to even
        x_nchw = jnp.pad(x_nchw, ((0, 0), (0, 0), (0, ph), (0, pw)))
        H += ph
        W += pw
    Hp, Wp = H // 2 + 1, W // 2 + 1
    xp = jnp.pad(x_nchw, ((0, 0), (0, 0), (1, 1), (1, 1)))
    # z[bt, (2*dh+dw)*C + c, i*Wp + j] = xp[bt, c, 2i+dh, 2j+dw]
    z = xp.reshape(BT, C, Hp, 2, Wp, 2).transpose(0, 3, 5, 1, 2, 4)
    z = z.reshape(BT, 4 * C, Hp * Wp)
    offs = [uh * Wp + uw for uh in (0, 1) for uw in (0, 1)]
    return z, offs, Hp - 1, Wp                       # Ho, row width (valid Wo = Wp-1)


def _pack_w_stride2_t(w_hwio):
    """(3,3,Cin,Cout) -> (Cout, 4*4*Cin) matching _prep_stride2_cm layout."""
    Cin, Cout = w_hwio.shape[2], w_hwio.shape[3]
    zero = jnp.zeros((Cin, Cout), w_hwio.dtype)
    taps = []
    for uh in (0, 1):
        for uw in (0, 1):
            rows = []
            for dh in (0, 1):
                for dw in (0, 1):
                    kh, kw = 2 * uh + dh, 2 * uw + dw
                    rows.append(w_hwio[kh, kw] if (kh < 3 and kw < 3) else zero)
            taps.append(jnp.concatenate(rows, axis=0))       # (4*Cin, Cout)
    w = jnp.stack(taps, axis=0)                               # (4, 4*Cin, Cout)
    return w.reshape(4 * 4 * Cin, Cout).T                     # (Cout, 16*Cin)


def _prep_stride1_cm(x_nchw):
    BT, C, H, W = x_nchw.shape
    Wr = W + 2
    xp = jnp.pad(x_nchw, ((0, 0), (0, 0), (1, 1), (1, 1)))
    z = xp.reshape(BT, C, (H + 2) * Wr)
    offs = [kh * Wr + kw for kh in range(3) for kw in range(3)]
    return z, offs, H, Wr                                     # Ho, row width (valid Wo = W)


def _pack_w_stride1_t(w_hwio):
    Cin, Cout = w_hwio.shape[2], w_hwio.shape[3]
    w = jnp.stack([w_hwio[kh, kw] for kh in range(3) for kw in range(3)], axis=0)
    return w.reshape(9 * Cin, Cout).T                         # (Cout, 9*Cin)


# ----------------------------------------------------------------------------
# FireStateEncoder forward (Pallas-backed).
# ----------------------------------------------------------------------------
def fire_state_encoder_forward(x_btchw, params, *, reduction_factor=4):
    """x: [B, T, C, H, W] -> [B, T, output_dim, H', W'] (matches the nn.Module)."""
    B, T, C, H, W = x_btchw.shape
    stride = 2 if reduction_factor > 1 else 1

    # Fold time into batch; stay NCHW / channel-major end-to-end (no transposes).
    x = x_btchw.reshape(B * T, C, H, W).astype(jnp.bfloat16)  # 0/1 mask exact in bf16

    w_proj, b_proj = params["proj"]
    n_conv = len(params["conv"])
    for li, (w_hwio, b) in enumerate(params["conv"]):
        BT, _, _, Wi = x.shape
        if stride == 2:
            z, offs, Ho, Wrow = _prep_stride2_cm(x)
            wct = _pack_w_stride2_t(w_hwio)
            Wo = Wrow - 1
        else:
            z, offs, Ho, Wrow = _prep_stride1_cm(x)
            wct = _pack_w_stride1_t(w_hwio)
            Wo = Wi
        is_last = li == n_conv - 1
        yf = _conv_layer_pallas(
            z, wct, b.reshape(-1, 1).astype(jnp.float32), offs, Ho * Wrow,
            proj=(w_proj.T, b_proj.reshape(-1, 1)) if is_last else None,
            out_dtype=jnp.float32 if is_last else jnp.bfloat16)
        n_out = yf.shape[1]
        # Drop the padded/garbage rows; output is already NCHW for the next layer.
        x = yf[:, :, :Ho * Wrow].reshape(BT, n_out, Ho, Wrow)[:, :, :, :Wo]

    BT, D, Hf, Wf = x.shape
    return x.reshape(B, T, D, Hf, Wf)


# ----------------------------------------------------------------------------
# Deterministic parameter init (shapes from the module __init__).
# ----------------------------------------------------------------------------
def init_params(key, in_channels, base_num_filters, depth, output_dim):
    conv = []
    cur = in_channels
    for i in range(depth):
        out_c = base_num_filters * 2 ** i
        key, k_w, k_b = jax.random.split(key, 3)
        w = (jax.random.normal(k_w, (3, 3, cur, out_c), jnp.float32) * 0.1
             ).astype(jnp.bfloat16)
        b = jax.random.normal(k_b, (out_c,), jnp.float32) * 0.1
        conv.append((w, b))
        cur = out_c
    key, k_w, k_b = jax.random.split(key, 3)
    w_proj = (jax.random.normal(k_w, (cur, output_dim), jnp.float32) * 0.1
              ).astype(jnp.bfloat16)
    b_proj = jax.random.normal(k_b, (output_dim,), jnp.float32) * 0.1
    return {"conv": conv, "proj": (w_proj, b_proj)}


# ----------------------------------------------------------------------------
# Pure-JAX reference (lax.conv) with identical bf16/f32 dtype plumbing.
# ----------------------------------------------------------------------------
def reference_forward(x_btchw, params, *, reduction_factor=4):
    B, T, C, H, W = x_btchw.shape
    stride = 2 if reduction_factor > 1 else 1
    x = x_btchw.reshape(B * T, C, H, W).astype(jnp.bfloat16)
    for w_hwio, b in params["conv"]:
        y = lax.conv_general_dilated(
            x, w_hwio, window_strides=(stride, stride), padding=((1, 1), (1, 1)),
            dimension_numbers=("NCHW", "HWIO", "NCHW"),
            preferred_element_type=jnp.float32)
        x = jnp.maximum(y + b.reshape(1, -1, 1, 1), 0.0).astype(jnp.bfloat16)
    w_proj, b_proj = params["proj"]
    y = lax.conv_general_dilated(
        x, w_proj.reshape(1, 1, *w_proj.shape), window_strides=(1, 1),
        padding=((0, 0), (0, 0)), dimension_numbers=("NCHW", "HWIO", "NCHW"),
        preferred_element_type=jnp.float32) + b_proj.reshape(1, -1, 1, 1)
    BT, D, Hf, Wf = y.shape
    return y.reshape(B, T, D, Hf, Wf)


if __name__ == "__main__":
    # Small shapes consistent with the module's forward.
    B, T, C, H, W = 2, 3, 4, 16, 16
    base_num_filters, depth, output_dim, reduction_factor = 8, 2, 32, 4

    key = jax.random.PRNGKey(0)
    key, kx = jax.random.split(key)
    # fire bitmask-like input (0/1 values)
    x = (jax.random.uniform(kx, (B, T, C, H, W)) > 0.5).astype(jnp.float32)

    params = init_params(key, C, base_num_filters, depth, output_dim)

    fwd = jax.jit(functools.partial(fire_state_encoder_forward,
                                    reduction_factor=reduction_factor))
    out = jax.block_until_ready(fwd(x, params))

    ref = jax.block_until_ready(
        reference_forward(x, params, reduction_factor=reduction_factor))

    expected_hw = H // (2 ** depth) if reduction_factor > 1 else H
    assert out.shape == (B, T, output_dim, expected_hw, expected_hw), out.shape
    assert out.dtype == jnp.float32
    max_err = float(jnp.max(jnp.abs(out - ref)))
    assert jnp.allclose(out, ref, atol=5e-3, rtol=5e-3), \
        f"mismatch vs reference (max abs err {max_err})"

    print("KERNEL_OK")
</pallas_src>

<mosaic_0001>
module attributes {stable_mosaic.version = 11 : i64} {
  func.func @kernel(%arg0: i32, %arg1: memref<1x16x256xbf16, #tpu.memory_space<vmem>>, %arg2: memref<8x64xbf16, #tpu.memory_space<vmem>>, %arg3: memref<8x1xf32, #tpu.memory_space<vmem>>, %arg4: memref<1x8x128xbf16, #tpu.memory_space<vmem>>) attributes {dimension_semantics = [#tpu.dimension_semantics<parallel>], iteration_bounds = array<i64: 6>, scalar_prefetch = 0 : i64, scratch_operands = 0 : i64, tpu.core_type = #tpu.core_type<tc>, window_params = [{transform_indices = @transform_0, window_bounds = array<i64: 1, 16, 256>}, {pipeline_mode = #tpu.pipeline_mode<synchronous>, transform_indices = @transform_1, window_bounds = array<i64: 8, 64>}, {pipeline_mode = #tpu.pipeline_mode<synchronous>, transform_indices = @transform_2, window_bounds = array<i64: 8, 1>}, {transform_indices = @transform_3, window_bounds = array<i64: 1, 8, 128>}]} {
    %c0 = arith.constant 0 : index
    %c0_0 = arith.constant 0 : index
    %0 = vector.load %arg2[%c0, %c0_0] : memref<8x64xbf16, #tpu.memory_space<vmem>>, vector<8x64xbf16>
    %c0_1 = arith.constant 0 : index
    %c0_2 = arith.constant 0 : index
    %1 = vector.load %arg3[%c0_1, %c0_2] : memref<8x1xf32, #tpu.memory_space<vmem>>, vector<8x1xf32>
    %c0_3 = arith.constant 0 : index
    %c0_4 = arith.constant 0 : index
    %c0_5 = arith.constant 0 : index
    %2 = vector.load %arg1[%c0_3, %c0_4, %c0_5] : memref<1x16x256xbf16, #tpu.memory_space<vmem>>, vector<1x16x128xbf16>
    %3 = vector.shape_cast %2 : vector<1x16x128xbf16> to vector<16x128xbf16>
    %c0_6 = arith.constant 0 : index
    %c0_7 = arith.constant 0 : index
    %c1 = arith.constant 1 : index
    %4 = vector.load %arg1[%c0_6, %c0_7, %c1] : memref<1x16x256xbf16, #tpu.memory_space<vmem>>, vector<1x16x128xbf16>
    %5 = vector.shape_cast %4 : vector<1x16x128xbf16> to vector<16x128xbf16>
    %c0_8 = arith.constant 0 : index
    %c0_9 = arith.constant 0 : index
    %c9 = arith.constant 9 : index
    %6 = vector.load %arg1[%c0_8, %c0_9, %c9] : memref<1x16x256xbf16, #tpu.memory_space<vmem>>, vector<1x16x128xbf16>
    %7 = vector.shape_cast %6 : vector<1x16x128xbf16> to vector<16x128xbf16>
    %c0_10 = arith.constant 0 : index
    %c0_11 = arith.constant 0 : index
    %c10 = arith.constant 10 : index
    %8 = vector.load %arg1[%c0_10, %c0_11, %c10] : memref<1x16x256xbf16, #tpu.memory_space<vmem>>, vector<1x16x128xbf16>
    %9 = vector.shape_cast %8 : vector<1x16x128xbf16> to vector<16x128xbf16>
    %10 = tpu.concatenate %3, %5, %7, %9 in 0 : vector<16x128xbf16>, vector<16x128xbf16>, vector<16x128xbf16>, vector<16x128xbf16> -> vector<64x128xbf16>
    %cst = arith.constant dense<0.000000e+00> : vector<8x128xf32>
    %11 = tpu.matmul %0, %10, %cst {dimension_numbers = #tpu.dot_dimension_numbers<[1], [0], [0], [1], [0, 0, 1, 1], [], []>} : vector<8x64xbf16>, vector<64x128xbf16>, vector<8x128xf32> -> vector<8x128xf32>
    %12 = vector.broadcast %1 : vector<8x1xf32> to vector<8x128xf32>
    %13 = arith.addf %11, %12 : vector<8x128xf32>
    %cst_12 = arith.constant 0.000000e+00 : f32
    %14 = vector.broadcast %cst_12 : f32 to vector<8x128xf32>
    %15 = arith.maximumf %13, %14 : vector<8x128xf32>
    %16 = arith.truncf %15 : vector<8x128xf32> to vector<8x128xbf16>
    %c0_13 = arith.constant 0 : index
    %c0_14 = arith.constant 0 : index
    %c0_15 = arith.constant 0 : index
    %17 = vector.load %arg4[%c0_13, %c0_14, %c0_15] : memref<1x8x128xbf16, #tpu.memory_space<vmem>>, vector<1x8x128xbf16>
    %18 = vector.shape_cast %17 : vector<1x8x128xbf16> to vector<8x128xbf16>
    %19 = vector.shape_cast %16 : vector<8x128xbf16> to vector<1x8x128xbf16>
    tpu.vector_store %arg4[%c0_13, %c0_14, %c0_15], %19 {strides = array<i32>} : memref<1x8x128xbf16, #tpu.memory_space<vmem>>, vector<1x8x128xbf16>,
    return
  }
  func.func @transform_0(%arg0: i32) -> (i32, i32, i32) {
    %c0_i32 = arith.constant 0 : i32
    %c0_i32_0 = arith.constant 0 : i32
    %c0_i32_1 = arith.constant 0 : i32
    return %arg0, %c0_i32, %c0_i32_0 : i32, i32, i32
  }
  func.func @transform_1(%arg0: i32) -> (i32, i32) {
    %c0_i32 = arith.constant 0 : i32
    %c0_i32_0 = arith.constant 0 : i32
    %c0_i32_1 = arith.constant 0 : i32
    return %c0_i32, %c0_i32_0 : i32, i32
  }
  func.func @transform_2(%arg0: i32) -> (i32, i32) {
    %c0_i32 = arith.constant 0 : i32
    %c0_i32_0 = arith.constant 0 : i32
    %c0_i32_1 = arith.constant 0 : i32
    return %c0_i32, %c0_i32_0 : i32, i32
  }
  func.func @transform_3(%arg0: i32) -> (i32, i32, i32) {
    %c0_i32 = arith.constant 0 : i32
    %c0_i32_0 = arith.constant 0 : i32
    %c0_i32_1 = arith.constant 0 : i32
    return %arg0, %c0_i32, %c0_i32_0 : i32, i32, i32
  }
}

module attributes {stable_mosaic.version = 11 : i64} {
  func.func @kernel(%arg0: i32, %arg1: memref<1x32x256xbf16, #tpu.memory_space<vmem>>, %arg2: memref<16x128xbf16, #tpu.memory_space<vmem>>, %arg3: memref<16x1xf32, #tpu.memory_space<vmem>>, %arg4: memref<32x16xbf16, #tpu.memory_space<vmem>>, %arg5: memref<32x1xf32, #tpu.memory_space<vmem>>, %arg6: memref<1x32x128xf32, #tpu.memory_space<vmem>>) attributes {dimension_semantics = [#tpu.dimension_semantics<parallel>], iteration_bounds = array<i64: 6>, scalar_prefetch = 0 : i64, scratch_operands = 0 : i64, tpu.core_type = #tpu.core_type<tc>, window_params = [{transform_indices = @transform_0, window_bounds = array<i64: 1, 32, 256>}, {pipeline_mode = #tpu.pipeline_mode<synchronous>, transform_indices = @transform_1, window_bounds = array<i64: 16, 128>}, {pipeline_mode = #tpu.pipeline_mode<synchronous>, transform_indices = @transform_2, window_bounds = array<i64: 16, 1>}, {pipeline_mode = #tpu.pipeline_mode<synchronous>, transform_indices = @transform_3, window_bounds = array<i64: 32, 16>}, {pipeline_mode = #tpu.pipeline_mode<synchronous>, transform_indices = @transform_4, window_bounds = array<i64: 32, 1>}, {transform_indices = @transform_5, window_bounds = array<i64: 1, 32, 128>}]} {
    %c0 = arith.constant 0 : index
    %c0_0 = arith.constant 0 : index
    %0 = vector.load %arg2[%c0, %c0_0] : memref<16x128xbf16, #tpu.memory_space<vmem>>, vector<16x128xbf16>
    %c0_1 = arith.constant 0 : index
    %c0_2 = arith.constant 0 : index
    %1 = vector.load %arg3[%c0_1, %c0_2] : memref<16x1xf32, #tpu.memory_space<vmem>>, vector<16x1xf32>
    %c0_3 = arith.constant 0 : index
    %c0_4 = arith.constant 0 : index
    %2 = vector.load %arg4[%c0_3, %c0_4] : memref<32x16xbf16, #tpu.memory_space<vmem>>, vector<32x16xbf16>
    %c0_5 = arith.constant 0 : index
    %c0_6 = arith.constant 0 : index
    %3 = vector.load %arg5[%c0_5, %c0_6] : memref<32x1xf32, #tpu.memory_space<vmem>>, vector<32x1xf32>
    %c0_7 = arith.constant 0 : index
    %c0_8 = arith.constant 0 : index
    %c0_9 = arith.constant 0 : index
    %4 = vector.load %arg1[%c0_7, %c0_8, %c0_9] : memref<1x32x256xbf16, #tpu.memory_space<vmem>>, vector<1x32x128xbf16>
    %5 = vector.shape_cast %4 : vector<1x32x128xbf16> to vector<32x128xbf16>
    %c0_10 = arith.constant 0 : index
    %c0_11 = arith.constant 0 : index
    %c1 = arith.constant 1 : index
    %6 = vector.load %arg1[%c0_10, %c0_11, %c1] : memref<1x32x256xbf16, #tpu.memory_space<vmem>>, vector<1x32x128xbf16>
    %7 = vector.shape_cast %6 : vector<1x32x128xbf16> to vector<32x128xbf16>
    %c0_12 = arith.constant 0 : index
    %c0_13 = arith.constant 0 : index
    %c5 = arith.constant 5 : index
    %8 = vector.load %arg1[%c0_12, %c0_13, %c5] : memref<1x32x256xbf16, #tpu.memory_space<vmem>>, vector<1x32x128xbf16>
    %9 = vector.shape_cast %8 : vector<1x32x128xbf16> to vector<32x128xbf16>
    %c0_14 = arith.constant 0 : index
    %c0_15 = arith.constant 0 : index
    %c6 = arith.constant 6 : index
    %10 = vector.load %arg1[%c0_14, %c0_15, %c6] : memref<1x32x256xbf16, #tpu.memory_space<vmem>>, vector<1x32x128xbf16>
    %11 = vector.shape_cast %10 : vector<1x32x128xbf16> to vector<32x128xbf16>
    %12 = tpu.concatenate %5, %7, %9, %11 in 0 : vector<32x128xbf16>, vector<32x128xbf16>, vector<32x128xbf16>, vector<32x128xbf16> -> vector<128x128xbf16>
    %cst = arith.constant dense<0.000000e+00> : vector<16x128xf32>
    %13 = tpu.matmul %0, %12, %cst {dimension_numbers = #tpu.dot_dimension_numbers<[1], [0], [0], [1], [0, 0, 1, 1], [], []>} : vector<16x128xbf16>, vector<128x128xbf16>, vector<16x128xf32> -> vector<16x128xf32>
    %14 = vector.broadcast %1 : vector<16x1xf32> to vector<16x128xf32>
    %15 = arith.addf %13, %14 : vector<16x128xf32>
    %cst_16 = arith.constant 0.000000e+00 : f32
    %16 = vector.broadcast %cst_16 : f32 to vector<16x128xf32>
    %17 = arith.maximumf %15, %16 : vector<16x128xf32>
    %18 = arith.truncf %17 : vector<16x128xf32> to vector<16x128xbf16>
    %cst_17 = arith.constant dense<0.000000e+00> : vector<32x128xf32>
    %19 = tpu.matmul %2, %18, %cst_17 {dimension_numbers = #tpu.dot_dimension_numbers<[1], [0], [0], [1], [0, 0, 1, 1], [], []>} : vector<32x16xbf16>, vector<16x128xbf16>, vector<32x128xf32> -> vector<32x128xf32>
    %20 = vector.broadcast %3 : vector<32x1xf32> to vector<32x128xf32>
    %21 = arith.addf %19, %20 : vector<32x128xf32>
    %c0_18 = arith.constant 0 : index
    %c0_19 = arith.constant 0 : index
    %c0_20 = arith.constant 0 : index
    %22 = vector.load %arg6[%c0_18, %c0_19, %c0_20] : memref<1x32x128xf32, #tpu.memory_space<vmem>>, vector<1x32x128xf32>
    %23 = vector.shape_cast %22 : vector<1x32x128xf32> to vector<32x128xf32>
    %24 = vector.shape_cast %21 : vector<32x128xf32> to vector<1x32x128xf32>
    tpu.vector_store %arg6[%c0_18, %c0_19, %c0_20], %24 {strides = array<i32>} : memref<1x32x128xf32, #tpu.memory_space<vmem>>, vector<1x32x128xf32>,
    return
  }
  func.func @transform_0(%arg0: i32) -> (i32, i32, i32) {
    %c0_i32 = arith.constant 0 : i32
    %c0_i32_0 = arith.constant 0 : i32
    %c0_i32_1 = arith.constant 0 : i32
    return %arg0, %c0_i32, %c0_i32_0 : i32, i32, i32
  }
  func.func @transform_1(%arg0: i32) -> (i32, i32) {
    %c0_i32 = arith.constant 0 : i32
    %c0_i32_0 = arith.constant 0 : i32
    %c0_i32_1 = arith.constant 0 : i32
    return %c0_i32, %c0_i32_0 : i32, i32
  }
  func.func @transform_2(%arg0: i32) -> (i32, i32) {
    %c0_i32 = arith.constant 0 : i32
    %c0_i32_0 = arith.constant 0 : i32
    %c0_i32_1 = arith.constant 0 : i32
    return %c0_i32, %c0_i32_0 : i32, i32
  }
  func.func @transform_3(%arg0: i32) -> (i32, i32) {
    %c0_i32 = arith.constant 0 : i32
    %c0_i32_0 = arith.constant 0 : i32
    %c0_i32_1 = arith.constant 0 : i32
    return %c0_i32, %c0_i32_0 : i32, i32
  }
  func.func @transform_4(%arg0: i32) -> (i32, i32) {
    %c0_i32 = arith.constant 0 : i32
    %c0_i32_0 = arith.constant 0 : i32
    %c0_i32_1 = arith.constant 0 : i32
    return %c0_i32, %c0_i32_0 : i32, i32
  }
  func.func @transform_5(%arg0: i32) -> (i32, i32, i32) {
    %c0_i32 = arith.constant 0 : i32
    %c0_i32_0 = arith.constant 0 : i32
    %c0_i32_1 = arith.constant 0 : i32
    return %arg0, %c0_i32, %c0_i32_0 : i32, i32, i32
  }
}

</mosaic_0001>

<bundles_post_ra>
// kernel: fire_state_encoder_forward.2
= control target key start
LH: loop header
LB: loop body
LE: loop exit
PB: predicated region body
PF: predicated region fallthrough
CT: control target
= control target key end

     0   :  { %s401_s12 = smov 0   ;;  %s433_s0 = inlined_call_operand.vmem [shape: bf16[6,16,256], index: 0, kind: input, shape index: {}]   ;;  %s434_s1 = inlined_call_operand.vmem [shape: bf16[8,64], index: 1, kind: input, shape index: {}]   ;;  %s435_s2 = inlined_call_operand.vmem [shape: f32[8,1], index: 2, kind: input, shape index: {}]   ;;  %s436_s3 = inlined_call_operand.vmem [shape: bf16[6,8,128], index: 3, kind: output, shape index: {}]  }
   0x1 LB: > { %s316_s13 = sadd.s32 4294967295, %s373_s12   ;;  %p320_p0 = scmp.ge.s32.totalorder %s373_s12, 1  ;;  %s373_s12 = sphi %s401_s12, %s13_s12  }
   0x2   : > { %p137_p1 = scmp.lt.s32.totalorder %s373_s12, 7 }
   0x4   : > { %p138_p2 = pnand %p320_p0, %p137_p1 }
   0x5   : > { %p160_p3 = scmp.lt.s32.totalorder (!%p138_p2), %s316_s13, 5  ;;  %s376_s18 = smov (!%p138_p2), 119  }
   0x6   : > { %141 = sbr.rel (%p138_p2) target bundleno = 350 (0x15e), region = 32  ;;  %s377_s19 = smov (!%p138_p2), 118  }
   0x7   : > { %s379_s20 = smov (!%p138_p2), 127  }
   0xb   : > { %v375_v0 = vmov 0.0   ;;  %s438_s13 = smov (!%p160_p3, %s316_s13), 5  ;;  %vm378_vm0 = vmmov 0   ;;  %v380_v3 = vmov 0   ;;  %v171_v4 = vld [vmem:[%s435_s2] sm:$0xff]  ;;  %vm208_vm1 = vcmask 965632  }
   0xc   : > { %336 = vmatprep.subr.bf16.mxu0 %v375_v0  ;;  %s330_s14 = sshll.u32 %s438_s13, 4  ;;  %344 = vmatprep.mubr.msk.bf16.mxu0 %vm378_vm0, %v375_v0  ;;  %vm201_vm2 = vcmask 973824   ;;  %vm194_vm3 = vcmask 1039360   ;;  %v170_v15 = vld [vmem:[%s434_s1] sm:$0xf]  ;;  %vm216_vm4 = vcmask 523264  }
   0xd   : > { %s415_s17 = scalar_lea.vmem %s433_s0, %s330_s14  ;;  %362 = vset.pattern.permute.xlu0 %v380_v3  ;;  %s323_s25 = sshll.u32 %s438_s13, 2 }
   0xe   : > { %v363_v1 = vld [vmem:[%s415_s17] ss:$8 sps:$4 sm:$0xff]   ;;  %v365_v2 = vld [vmem:[%s415_s17 + $0x4] ss:$8 sps:$4 sm:$0xff]   ;;  %s168_s28 = scalar_lea.vmem %s436_s3, %s323_s25 }
   0xf   : > { %197 = vrot.lane.b32.xlu1 %v363_v1, %s376_s18  ;;  %204 = vrot.lane.b32.xlu0 %v363_v1, %s377_s19  ;;  %v366_v14 = vld [vmem:[%s415_s17] ss:$8 sps:$4 sm:$0xff]  }
  0x13   : > { %199 = vrot.lane.b32.xlu1 %v365_v2, %s376_s18  ;;  %206 = vrot.lane.b32.xlu0 %v365_v2, %s377_s19 }
  0x17   : > { %192 = vrot.lane.b32.xlu1 %v365_v2, %s379_s20  ;;  %190 = vrot.lane.b32.xlu0 %v363_v1, %s379_s20 }
  0x1b   : > { %213 = vperm.xlu0 %362, %v171_v4  }
  0x81   : > { %v198_v5 = vpop.permute.xlu1 %197  ;;  %v205_v6 = vpop.permute.xlu0 %204 }
  0x85   : > { %v200_v7 = vpop.permute.xlu1 %199  ;;  %v207_v8 = vpop.permute.xlu0 %206 }
  0x86   : > { %v209_v9 = vsel %vm208_vm1, %v205_v6, %v207_v8  ;;  %v202_v12 = vsel %vm201_vm2, %v198_v5, %v200_v7 }
  0x87   : > { %337 = vmatpush3.bf16.msra.mxu0 %v209_v9 }
  0x88   : > { %338 = vmatprep.subr.bf16.mxu0 %v375_v0 }
  0x89   : > { %v193_v10 = vpop.permute.xlu1 %192  ;;  %v191_v11 = vpop.permute.xlu0 %190 }
  0x8a   : > { %v195_v13 = vsel %vm194_vm3, %v191_v11, %v193_v10 }
  0x8b   : > { %339 = vmatpush3.bf16.msra.mxu0 %v202_v12 }
  0x8c   : > { %340 = vmatprep.subr.bf16.mxu0 %v375_v0 }
  0x8f   : > { %341 = vmatpush3.bf16.msra.mxu0 %v195_v13 }
  0x90   : > { %342 = vmatprep.subr.bf16.mxu0 %v375_v0 }
  0x93   : > { %343 = vmatpush3.bf16.msra.mxu0 %v366_v14 }
  0x96   : > { %345 = vmatmul.mubr.msk.bf16.vlgmr.msra.gmra.mxu0 %vm216_vm4, %v170_v15  ;;  %v214_v16 = vpop.permute.xlu0 %213 }
 0x156   : > { %v254_v17 = vpop.f32.mrf.mxu0 }
 0x157   : > { %v255_v18 = vadd.f32 %v254_v17, %v214_v16 }
 0x158   : > { %v346_v19 = vpop.f32.mrf.mxu0 }
 0x159   : > { %v260_v20 = vmax.f32 %v255_v18, 0.0 }
 0x15a   : > { %v257_v21 = vpop.f32.mrf.mxu0 }
 0x15b   : > { %v261_v22 = vpack.c.bf16 %v260_v20, %v260_v20 }
 0x15c   : > { %v347_v23 = vpop.f32.mrf.mxu0 }
 0x15d   : > { %262 = vst [vmem:[%s168_s28] sm:$0xf] %v261_v22 }
 0x15e PF: > { %s13_s12 = sadd.s32 1, %s373_s12  }
 0x15f   : > { %p10_p4 = scmp.ge.s32.totalorder %s13_s12, 8  }
 0x161   :  { %12 = sbr.rel (!%p10_p4) target bundleno = 1 (0x1), region = 62 }

// kernel: fire_state_encoder_forward.3
= control target key start
LH: loop header
LB: loop body
LE: loop exit
PB: predicated region body
PF: predicated region fallthrough
CT: control target
= control target key end

     0   :  { %s651_s18 = smov 0   ;;  %s721_s0 = inlined_call_operand.vmem [shape: bf16[6,32,256], index: 0, kind: input, shape index: {}]   ;;  %s722_s1 = inlined_call_operand.vmem [shape: bf16[16,128], index: 1, kind: input, shape index: {}]   ;;  %s723_s2 = inlined_call_operand.vmem [shape: f32[16,1], index: 2, kind: input, shape index: {}]   ;;  %s724_s3 = inlined_call_operand.vmem [shape: bf16[32,16], index: 3, kind: input, shape index: {}]   ;;  %s725_s4 = inlined_call_operand.vmem [shape: f32[32,1], index: 4, kind: input, shape index: {}]   ;;  %s726_s5 = inlined_call_operand.vmem [shape: f32[6,32,128], index: 5, kind: output, shape index: {}]  }
   0x1 LB: > { %s518_s19 = sadd.s32 4294967295, %s613_s18   ;;  %p522_p0 = scmp.ge.s32.totalorder %s613_s18, 1  ;;  %s613_s18 = sphi %s651_s18, %s15_s18  }
   0x2   : > { %p187_p1 = scmp.lt.s32.totalorder %s613_s18, 7 }
   0x4   : > { %p188_p2 = pnand %p522_p0, %p187_p1 }
   0x5   : > { %p215_p3 = scmp.lt.s32.totalorder (!%p188_p2), %s518_s19, 5  ;;  %s616_s24 = smov (!%p188_p2), 122  }
   0x6   : > { %191 = sbr.rel (%p188_p2) target bundleno = 575 (0x23f), region = 40  ;;  %s617_s25 = smov (!%p188_p2), 123  }
   0x7   : > { %s618_s26 = smov (!%p188_p2), 127  }
   0xb   : > { %v615_v0 = vmov 0.0   ;;  %s728_s19 = smov (!%p215_p3, %s518_s19), 5  ;;  %vm619_vm0 = vmmov 0   ;;  %v228_v5 = vld [vmem:[%s723_s2] sm:$0xff]  ;;  %v229_v6 = vld [vmem:[%s723_s2 + $0x8] sm:$0xff]  ;;  %v620_v7 = vmov 0  }
   0xc   : > { %554 = vmatprep.subr.bf16.mxu0 %v615_v0  ;;  %s540_s20 = sshll.u32 %s728_s19, 5  ;;  %570 = vmatprep.mubr.msk.bf16.mxu0 %vm619_vm0, %v615_v0  ;;  %v235_v8 = vld [vmem:[%s725_s4 + $0x8] sm:$0xff]  ;;  %v234_v9 = vld [vmem:[%s725_s4] sm:$0xff]  ;;  %v237_v10 = vld [vmem:[%s725_s4 + $0x18] sm:$0xff]  ;;  %vm308_vm1 = vcmask 998400   ;;  %vm295_vm2 = vcmask 1006592  }
   0xd   : > { %s668_s23 = scalar_lea.vmem %s721_s0, %s540_s20  ;;  %595 = vset.pattern.permute.xlu1 %v620_v7  ;;  %594 = vset.pattern.permute.xlu0 %v620_v7  ;;  %v236_v11 = vld [vmem:[%s725_s4 + $0x10] sm:$0xff]  ;;  %vm282_vm3 = vcmask 1039360   ;;  %v604_v32 = vld [vmem:[%s722_s1] sm:$0xff]   ;;  %vm403_vm4 = vcmask 130048   ;;  %v606_v45 = vld [vmem:[%s724_s3 + $0x8] sm:$0xff]  }
   0xe   : > { %v596_v1 = vld [vmem:[%s668_s23 + $0x10] ss:$8 sps:$4 sm:$0xff]   ;;  %v598_v2 = vld [vmem:[%s668_s23] ss:$8 sps:$4 sm:$0xff]   ;;  %v600_v3 = vld [vmem:[%s668_s23 + $0x14] ss:$8 sps:$4 sm:$0xff]  }
   0xf   : > { %304 = vrot.lane.b32.xlu0 %v596_v1, %s616_s24  ;;  %v601_v4 = vld [vmem:[%s668_s23 + $0x4] ss:$8 sps:$4 sm:$0xff]   ;;  %300 = vrot.lane.b32.xlu1 %v598_v2, %s616_s24  ;;  %v602_v30 = vld [vmem:[%s668_s23 + $0x10] ss:$8 sps:$4 sm:$0xff]  }
  0x10   : > { %v603_v31 = vld [vmem:[%s668_s23] ss:$8 sps:$4 sm:$0xff]  }
  0x11   : > { %v605_v33 = vld [vmem:[%s724_s3] sm:$0xff]  }
  0x12   : > { %576 = vmatprep.mubr.msk.bf16.mxu1 %vm403_vm4, %v605_v33 }
  0x13   : > { %306 = vrot.lane.b32.xlu0 %v600_v3, %s616_s24  ;;  %302 = vrot.lane.b32.xlu1 %v601_v4, %s616_s24 }
  0x17   : > { %291 = vrot.lane.b32.xlu0 %v596_v1, %s617_s25  ;;  %293 = vrot.lane.b32.xlu1 %v600_v3, %s617_s25 }
  0x1b   : > { %287 = vrot.lane.b32.xlu0 %v598_v2, %s617_s25  ;;  %289 = vrot.lane.b32.xlu1 %v601_v4, %s617_s25  ;;  %s224_s25 = scalar_lea.vmem %s726_s5, %s540_s20 }
  0x1f   : > { %278 = vrot.lane.b32.xlu0 %v596_v1, %s618_s26  ;;  %280 = vrot.lane.b32.xlu1 %v600_v3, %s618_s26 }
  0x23   : > { %274 = vrot.lane.b32.xlu0 %v598_v2, %s618_s26  ;;  %276 = vrot.lane.b32.xlu1 %v601_v4, %s618_s26 }
  0x27   : > { %315 = vperm.xlu0 %594, %v228_v5   ;;  %320 = vperm.xlu1 %595, %v229_v6  }
  0x2b   : > { %380 = vperm.xlu0 %594, %v235_v8   ;;  %375 = vperm.xlu1 %595, %v234_v9  }
  0x2f   : > { %390 = vperm.xlu0 %594, %v237_v10   ;;  %385 = vperm.xlu1 %595, %v236_v11  }
  0x81   : > { %v305_v12 = vpop.permute.xlu0 %304  ;;  %v301_v13 = vpop.permute.xlu1 %300 }
  0x85   : > { %v307_v14 = vpop.permute.xlu0 %306  ;;  %v303_v15 = vpop.permute.xlu1 %302 }
  0x86   : > { %v310_v16 = vsel %vm308_vm1, %v305_v12, %v307_v14  ;;  %v309_v18 = vsel %vm308_vm1, %v301_v13, %v303_v15 }
  0x87   : > { %555 = vmatpush3.bf16.msra.mxu0 %v310_v16 }
  0x88   : > { %556 = vmatprep.subr.bf16.mxu0 %v615_v0 }
  0x89   : > { %v292_v17 = vpop.permute.xlu0 %291  ;;  %v294_v19 = vpop.permute.xlu1 %293 }
  0x8a   : > { %v297_v20 = vsel %vm295_vm2, %v292_v17, %v294_v19 }
  0x8b   : > { %557 = vmatpush3.bf16.msra.mxu0 %v309_v18 }
  0x8c   : > { %558 = vmatprep.subr.bf16.mxu0 %v615_v0 }
  0x8d   : > { %v288_v21 = vpop.permute.xlu0 %287  ;;  %v290_v22 = vpop.permute.xlu1 %289 }
  0x8e   : > { %v296_v23 = vsel %vm295_vm2, %v288_v21, %v290_v22 }
  0x8f   : > { %559 = vmatpush3.bf16.msra.mxu0 %v297_v20 }
  0x90   : > { %560 = vmatprep.subr.bf16.mxu0 %v615_v0 }
  0x91   : > { %v279_v24 = vpop.permute.xlu0 %278  ;;  %v281_v25 = vpop.permute.xlu1 %280 }
  0x92   : > { %v284_v26 = vsel %vm282_vm3, %v279_v24, %v281_v25 }
  0x93   : > { %561 = vmatpush3.bf16.msra.mxu0 %v296_v23 }
  0x94   : > { %562 = vmatprep.subr.bf16.mxu0 %v615_v0 }
  0x95   : > { %v275_v27 = vpop.permute.xlu0 %274  ;;  %v277_v28 = vpop.permute.xlu1 %276 }
  0x96   : > { %v283_v29 = vsel %vm282_vm3, %v275_v27, %v277_v28 }
  0x97   : > { %563 = vmatpush3.bf16.msra.mxu0 %v284_v26 }
  0x98   : > { %564 = vmatprep.subr.bf16.mxu0 %v615_v0 }
  0x9b   : > { %565 = vmatpush3.bf16.msra.mxu0 %v283_v29 }
  0x9c   : > { %566 = vmatprep.subr.bf16.mxu0 %v615_v0 }
  0x9f   : > { %567 = vmatpush3.bf16.msra.mxu0 %v602_v30 }
  0xa0   : > { %568 = vmatprep.subr.bf16.mxu0 %v615_v0 }
  0xa2   : > { %v316_v35 = vpop.permute.xlu0 %315  ;;  %v321_v38 = vpop.permute.xlu1 %320 }
  0xa3   : > { %569 = vmatpush3.bf16.msra.mxu0 %v603_v31 }
  0xa6   : > { %571 = vmatmul.mubr.bf16.vlgmr.msra.gmra.mxu0 %v604_v32  ;;  %v376_v46 = vpop.permute.xlu1 %375  ;;  %v381_v47 = vpop.permute.xlu0 %380 }
  0xaa   : > { %v386_v48 = vpop.permute.xlu1 %385  ;;  %v391_v53 = vpop.permute.xlu0 %390 }
 0x166   : > { %v363_v34 = vpop.f32.mrf.mxu0 }
 0x167   : > { %v364_v37 = vadd.f32 %v363_v34, %v316_v35 }
 0x168   : > { %v572_v36 = vpop.f32.mrf.mxu0 }
 0x169   : > { %v370_v42 = vmax.f32 %v364_v37, 0.0 }
 0x16a   : > { %v366_v39 = vpop.f32.mrf.mxu0 }
 0x16b   : > { %v367_v40 = vadd.f32 %v366_v39, %v321_v38 }
 0x16c   : > { %v573_v41 = vpop.f32.mrf.mxu0 }
 0x16d   : > { %v371_v43 = vmax.f32 %v367_v40, 0.0 }
 0x16f   : > { %v372_v44 = vpack.c.bf16 %v371_v43, %v370_v42 }
 0x171   : > { %574 = vmatprep.subr.bf16.mxu1 %v372_v44 }
 0x172   : > { %575 = vmatpush3.bf16.msra.mxu1 %v372_v44 }
 0x175   : > { %577 = vmatmul.mubr.msk.bf16.vlgmr.msra.gmra.mxu1 %vm403_vm4, %v606_v45 }
 0x235   : > { %v578_v49 = vpop.f32.mrf.mxu1 }
 0x236   : > { %v453_v50 = vadd.f32 %v578_v49, %v386_v48 }
 0x237   : > { %v444_v51 = vpop.f32.mrf.mxu1 }
 0x238   : > { %461 = vst [vmem:[%s224_s25 + $0x10] sm:$0xff] %v453_v50  ;;  %v445_v52 = vadd.f32 %v444_v51, %v376_v46 }
 0x239   : > { %v579_v54 = vpop.f32.mrf.mxu1 }
 0x23a   : > { %459 = vst [vmem:[%s224_s25] sm:$0xff] %v445_v52  ;;  %v456_v55 = vadd.f32 %v579_v54, %v391_v53 }
 0x23b   : > { %v447_v56 = vpop.f32.mrf.mxu1 }
 0x23c   : > { %462 = vst [vmem:[%s224_s25 + $0x18] sm:$0xff] %v456_v55  ;;  %v448_v57 = vadd.f32 %v447_v56, %v381_v47 }
 0x23e   : > { %460 = vst [vmem:[%s224_s25 + $0x8] sm:$0xff] %v448_v57 }
 0x23f PF: > { %s15_s18 = sadd.s32 1, %s613_s18  }
 0x240   : > { %p12_p4 = scmp.ge.s32.totalorder %s15_s18, 8  }
 0x242   :  { %14 = sbr.rel (!%p12_p4) target bundleno = 1 (0x1), region = 70 }

</bundles_post_ra>
